<compile_context>
chip_gen: v7x
topology: tpu7x:2x2x1
jax: 0.10.0
libtpu: 0.0.40
codegen_flags: <defaults>
</compile_context>

<pallas_src>
import functools

import jax
import jax.numpy as jnp
from jax import lax
from jax.experimental import pallas as pl
from jax.experimental.pallas import tpu as pltpu

LEAKY_SLOPE = 0.01            # F.leaky_relu default negative_slope
_PIX_CHUNK = 512              # lanes per in-kernel pixel sub-chunk
_HID_CHUNK = 512              # rows per in-kernel hidden sub-chunk
_SMALL_PROBLEM_BYTES = 1 << 20  # below this, plain XLA beats pallas launch overhead


def _cdiv(a, b):
    return -(-a // b)


def _round_up(a, m):
    return _cdiv(a, m) * m


def _generation_params():
    """Per-TPU-generation tiling knobs (VMEM budget/cap, bytes-per-step target)."""
    try:
        kind = jax.devices()[0].device_kind.lower()
    except Exception:
        kind = ""
    try:
        vmem_cap = int(pltpu.get_tpu_info().vmem_capacity_bytes)
    except Exception:
        vmem_cap = 128 * 1024 * 1024
    if ("v7" in kind) or vmem_cap <= 80 * 1024 * 1024:
        # v7x: 64 MiB VMEM / TC, ~3.2 TB/s HBM / TC, 2 TensorCores per chip.
        return dict(vmem_budget=40 << 20, vmem_cap=48 << 20,
                    step_bytes=6 << 20, min_steps=8, even_steps=True)
    if "v5" in kind:
        # v5e: ~0.82 TB/s HBM, 128 MiB VMEM (scoped default is only 16 MiB).
        return dict(vmem_budget=80 << 20, vmem_cap=100 << 20,
                    step_bytes=2 << 20, min_steps=4, even_steps=False)
    # v6e & default: 128 MiB VMEM, ~1.4 TB/s HBM.
    return dict(vmem_budget=80 << 20, vmem_cap=100 << 20,
                step_bytes=3 << 20, min_steps=4, even_steps=False)


def _vmem_estimate(tn, Cin, Hid, Cout, x_itemsize, w_itemsize):
    fixed = (Cin * Hid + Hid * Cout) * w_itemsize + (Hid + Cout) * 4   # Buffered(1) weights
    per_col = 2 * (Cin + Cout) * x_itemsize                            # 2x-buffered x / out
    hid_chunk = min(Hid, _HID_CHUNK)
    chunk = min(_PIX_CHUNK, max(tn, 1))
    chunk_scratch = 2 * chunk * (Cin * 4 + 3 * hid_chunk * 4 + 2 * Cout * 4)
    return fixed + chunk_scratch + per_col * tn


def _pick_tile(B, HW, Cin, Hid, Cout, x_itemsize, w_itemsize, gen):
    """Pixel-tile width (lane axis): bytes-per-step target clamped by the VMEM budget."""
    fixed = (Cin * Hid + Hid * Cout) * w_itemsize + (Hid + Cout) * 4
    per_col = 2 * (Cin + Cout) * x_itemsize
    hid_chunk = min(Hid, _HID_CHUNK)
    chunk_scratch = 2 * _PIX_CHUNK * (Cin * 4 + 3 * hid_chunk * 4 + 2 * Cout * 4)

    avail = gen["vmem_budget"] - fixed - chunk_scratch
    tn_vmem = max(128, avail // per_col) if avail >= per_col * 128 else 128
    tn_bw = max(128, gen["step_bytes"] // ((Cin + Cout) * x_itemsize))
    tn = int(min(tn_vmem, tn_bw))
    tn = (tn // _PIX_CHUNK) * _PIX_CHUNK if tn >= _PIX_CHUNK else (tn // 128) * 128
    tn = max(128, tn)

    if tn >= HW:
        tn = HW                       # full-row block is always a legal block shape
    nblk = _cdiv(HW, tn)

    # keep the pipeline (and both v7x TensorCores) fed with enough grid steps
    if B * nblk < gen["min_steps"] and HW > 128:
        want_blk = max(nblk, _cdiv(gen["min_steps"], B))
        tn_new = max(128, _round_up(_cdiv(HW, want_blk), 128))
        if tn_new < tn:
            tn, nblk = tn_new, _cdiv(HW, tn_new)

    # prefer an even total step count on v7x (2 TensorCores per chip)
    if gen["even_steps"] and (B * nblk) % 2 == 1 and tn > 128:
        tn2 = max(128, _round_up(_cdiv(HW, nblk + 1), 128))
        if _cdiv(HW, tn2) == nblk + 1:
            tn = tn2

    return tn


def _make_mlp_kernel(Cin, Hid, Cout, tn):
    """Kernel factory: static pixel-chunk / hidden-chunk structure closed over."""
    chunk = min(_PIX_CHUNK, tn)
    n_full = tn // chunk
    rem = tn - n_full * chunk
    hid_chunk = min(Hid, _HID_CHUNK)
    hid_slices = [(h0, min(hid_chunk, Hid - h0)) for h0 in range(0, Hid, hid_chunk)]

    def kernel(x_ref, w1_ref, b1_ref, w2_ref, b2_ref, o_ref):
        # x_ref: (Cin, tn)   w1: (Hid, Cin)  b1: (Hid, 1)
        # w2: (Cout, Hid)    b2: (Cout, 1)   o_ref: (Cout, tn)
        def compute(start, size):
            sl = pl.ds(start, size)
            x = x_ref[:, sl]
            if x.dtype != w1_ref.dtype:
                x = x.astype(w1_ref.dtype)     # both MXU operands narrow for bf16 weights
            if len(hid_slices) == 1:
                h = jnp.dot(w1_ref[...], x, preferred_element_type=jnp.float32)
                h = h + b1_ref[...]
                h = jnp.maximum(h, LEAKY_SLOPE * h).astype(w2_ref.dtype)
                acc = jnp.dot(w2_ref[...], h, preferred_element_type=jnp.float32)
            else:
                acc = jnp.zeros((Cout, size), jnp.float32)
                for h0, hsz in hid_slices:     # static slices: zero-cost ref views
                    h = jnp.dot(w1_ref[h0:h0 + hsz, :], x,
                                preferred_element_type=jnp.float32)
                    h = h + b1_ref[h0:h0 + hsz, :]
                    h = jnp.maximum(h, LEAKY_SLOPE * h).astype(w2_ref.dtype)
                    acc = acc + jnp.dot(w2_ref[:, h0:h0 + hsz], h,
                                        preferred_element_type=jnp.float32)
            o_ref[:, sl] = (acc + b2_ref[...]).astype(o_ref.dtype)

        if n_full == 1:
            compute(0, chunk)
        elif n_full > 1:
            def body(i, carry):
                compute(pl.multiple_of(i * chunk, chunk), chunk)
                return carry
            lax.fori_loop(0, n_full, body, 0, unroll=(n_full <= 8))
        if rem > 0:
            compute(n_full * chunk, rem)

    return kernel


def _xla_forward(x3, w1, b1_col, w2, b2_col, out_dtype):
    """Plain XLA fallback for tiny problems / weights that do not fit VMEM."""
    xc = x3.astype(w1.dtype) if x3.dtype != w1.dtype else x3
    h = jnp.einsum("hc,bcn->bhn", w1, xc, preferred_element_type=jnp.float32) + b1_col
    h = jnp.maximum(h, LEAKY_SLOPE * h)
    o = jnp.einsum("oh,bhn->bon", w2, h.astype(w2.dtype),
                   preferred_element_type=jnp.float32) + b2_col
    return o.astype(out_dtype)


@functools.partial(jax.jit, static_argnames=("force_pallas", "tile_n"))
def mlp_forward(x_nchw, w1, b1, w2, b2, *, force_pallas=False, tile_n=None):
    """x_nchw: [B, Cin, H, W]; w1: [Hid, Cin]; b1: [Hid]; w2: [Cout, Hid]; b2: [Cout]
    (PyTorch Conv2d 1x1 layout with the kernel dims squeezed). Returns [B, Cout, H, W]."""
    B, Cin, H, W = x_nchw.shape
    Hid = w1.shape[0]
    Cout = w2.shape[0]
    HW = H * W
    x_itemsize = jnp.dtype(x_nchw.dtype).itemsize
    w_itemsize = jnp.dtype(w1.dtype).itemsize

    x3 = x_nchw.reshape(B, Cin, HW)                # free reshape, no NCHW->NHWC transpose
    b1_col = b1.reshape(Hid, 1).astype(jnp.float32)
    b2_col = b2.reshape(Cout, 1).astype(jnp.float32)

    gen = _generation_params()

    io_bytes = B * HW * (Cin + Cout) * x_itemsize
    weights_fit = _vmem_estimate(128, Cin, Hid, Cout, x_itemsize, w_itemsize) <= gen["vmem_budget"]
    if (io_bytes < _SMALL_PROBLEM_BYTES and not force_pallas) or not weights_fit:
        # Tiny problem (pure launch/pipeline overhead) or weights exceed VMEM budget.
        out3 = _xla_forward(x3, w1, b1_col, w2, b2_col, x_nchw.dtype)
        return out3.reshape(B, Cout, H, W)

    if tile_n is not None:
        tn = int(min(tile_n, HW))
    else:
        tn = _pick_tile(B, HW, Cin, Hid, Cout, x_itemsize, w_itemsize, gen)
    n_blocks = _cdiv(HW, tn)       # ragged last block is edge-masked by Pallas (no jnp.pad)

    vmem_est = _vmem_estimate(tn, Cin, Hid, Cout, x_itemsize, w_itemsize)
    vmem_limit = int(min(gen["vmem_cap"],
                         max(32 << 20, int(vmem_est * 1.5) + (4 << 20))))

    kernel = _make_mlp_kernel(Cin, Hid, Cout, tn)

    flops = 2 * B * HW * (Cin * Hid + Hid * Cout)
    bytes_accessed = (B * HW * (Cin + Cout) * x_itemsize
                      + (Cin * Hid + Hid * Cout) * w_itemsize + (Hid + Cout) * 4)

    out3 = pl.pallas_call(
        kernel,
        out_shape=jax.ShapeDtypeStruct((B, Cout, HW), x_nchw.dtype),
        grid_spec=pltpu.PrefetchScalarGridSpec(
            num_scalar_prefetch=0,
            grid=(B, n_blocks),
            in_specs=[
                pl.BlockSpec((pl.Squeezed(), Cin, tn), lambda b, j: (b, 0, j)),
                pl.BlockSpec((Hid, Cin), lambda b, j: (0, 0),
                             pipeline_mode=pl.Buffered(1)),
                pl.BlockSpec((Hid, 1), lambda b, j: (0, 0),
                             pipeline_mode=pl.Buffered(1)),
                pl.BlockSpec((Cout, Hid), lambda b, j: (0, 0),
                             pipeline_mode=pl.Buffered(1)),
                pl.BlockSpec((Cout, 1), lambda b, j: (0, 0),
                             pipeline_mode=pl.Buffered(1)),
            ],
            out_specs=pl.BlockSpec((pl.Squeezed(), Cout, tn), lambda b, j: (b, 0, j)),
        ),
        compiler_params=pltpu.CompilerParams(
            dimension_semantics=("parallel", "parallel"),
            vmem_limit_bytes=vmem_limit,
        ),
        cost_estimate=pl.CostEstimate(
            flops=int(flops), transcendentals=0, bytes_accessed=int(bytes_accessed)),
    )(x3, w1, b1_col, w2, b2_col)

    return out3.reshape(B, Cout, H, W)


def init_mlp_params(key, in_features, hidden_features=None, out_features=None,
                    dtype=jnp.float32):
    """Matches module __init__: trunc_normal(std=0.02) conv weights, zero bias.
    Weights stay in the PyTorch Conv2d layout [Cout, Cin] (1x1 kernel squeezed)."""
    hidden_features = hidden_features or in_features
    out_features = out_features or in_features
    k1, k2 = jax.random.split(key)
    w1 = (jax.random.truncated_normal(
        k1, -2.0, 2.0, (hidden_features, in_features), jnp.float32) * 0.02).astype(dtype)
    b1 = jnp.zeros((hidden_features,), jnp.float32)
    w2 = (jax.random.truncated_normal(
        k2, -2.0, 2.0, (out_features, hidden_features), jnp.float32) * 0.02).astype(dtype)
    b2 = jnp.zeros((out_features,), jnp.float32)
    return w1, b1, w2, b2


def _reference(x_nchw, w1, b1, w2, b2):
    # Pure-JAX f32 reference of the same math (1x1 convs == per-pixel matmuls).
    B, Cin, H, W = x_nchw.shape
    xf = x_nchw.reshape(B, Cin, H * W).astype(jnp.float32)
    h = jnp.einsum("hc,bcn->bhn", w1.astype(jnp.float32), xf) + b1[:, None]
    h = jnp.maximum(h, LEAKY_SLOPE * h)
    o = jnp.einsum("oh,bhn->bon", w2.astype(jnp.float32), h) + b2[:, None]
    return o.reshape(B, -1, H, W).astype(x_nchw.dtype)


if __name__ == "__main__":
    key = jax.random.PRNGKey(0)
    k_x, k_p, k_x2 = jax.random.split(key, 3)

    # Small shapes consistent with the module: B=2, C=4, H=W=16, hidden=32.
    B, Cin, H, W = 2, 4, 16, 16
    hidden = 32
    x = jax.random.normal(k_x, (B, Cin, H, W), dtype=jnp.float32)
    w1, b1, w2, b2 = init_mlp_params(k_p, Cin, hidden_features=hidden, out_features=Cin)

    # 1) Pallas path (forced: this shape is below the XLA-fallback threshold).
    out = jax.block_until_ready(mlp_forward(x, w1, b1, w2, b2, force_pallas=True))
    ref = _reference(x, w1, b1, w2, b2)
    assert out.shape == (B, Cin, H, W), out.shape
    assert jnp.allclose(out, ref, atol=1e-5, rtol=1e-5), "pallas mismatch vs reference"

    # 2) Ragged pixel tile (HW % tile_n != 0) exercises Pallas edge masking.
    x2 = jax.random.normal(k_x2, (1, Cin, 24, 24), dtype=jnp.float32)
    out2 = jax.block_until_ready(
        mlp_forward(x2, w1, b1, w2, b2, force_pallas=True, tile_n=256))
    ref2 = _reference(x2, w1, b1, w2, b2)
    assert jnp.allclose(out2, ref2, atol=1e-5, rtol=1e-5), "ragged-tile mismatch"

    # 3) Default dispatch (tiny problem -> plain XLA fallback path).
    out3 = jax.block_until_ready(mlp_forward(x, w1, b1, w2, b2))
    assert jnp.allclose(out3, ref, atol=1e-5, rtol=1e-5), "fallback mismatch"

    print("KERNEL_OK")
</pallas_src>

<mosaic_0001>
module attributes {stable_mosaic.version = 11 : i64} {
  func.func @kernel(%arg0: i32, %arg1: i32, %arg2: memref<1x4x128xf32, #tpu.memory_space<vmem>>, %arg3: memref<32x4xf32, #tpu.memory_space<vmem>>, %arg4: memref<32x1xf32, #tpu.memory_space<vmem>>, %arg5: memref<4x32xf32, #tpu.memory_space<vmem>>, %arg6: memref<4x1xf32, #tpu.memory_space<vmem>>, %arg7: memref<1x4x128xf32, #tpu.memory_space<vmem>>) attributes {dimension_semantics = [#tpu.dimension_semantics<parallel>, #tpu.dimension_semantics<parallel>], iteration_bounds = array<i64: 2, 2>, scalar_prefetch = 0 : i64, scratch_operands = 0 : i64, tpu.core_type = #tpu.core_type<tc>, window_params = [{transform_indices = @transform_0, window_bounds = array<i64: 1, 4, 128>}, {pipeline_mode = #tpu.pipeline_mode<synchronous>, transform_indices = @transform_1, window_bounds = array<i64: 32, 4>}, {pipeline_mode = #tpu.pipeline_mode<synchronous>, transform_indices = @transform_2, window_bounds = array<i64: 32, 1>}, {pipeline_mode = #tpu.pipeline_mode<synchronous>, transform_indices = @transform_3, window_bounds = array<i64: 4, 32>}, {pipeline_mode = #tpu.pipeline_mode<synchronous>, transform_indices = @transform_4, window_bounds = array<i64: 4, 1>}, {transform_indices = @transform_5, window_bounds = array<i64: 1, 4, 128>}]} {
    %c0 = arith.constant 0 : index
    %c0_0 = arith.constant 0 : index
    %c0_1 = arith.constant 0 : index
    %0 = vector.load %arg2[%c0, %c0_0, %c0_1] : memref<1x4x128xf32, #tpu.memory_space<vmem>>, vector<1x4x128xf32>
    %1 = vector.shape_cast %0 : vector<1x4x128xf32> to vector<4x128xf32>
    %c0_2 = arith.constant 0 : index
    %c0_3 = arith.constant 0 : index
    %2 = vector.load %arg3[%c0_2, %c0_3] : memref<32x4xf32, #tpu.memory_space<vmem>>, vector<32x4xf32>
    %cst = arith.constant dense<0.000000e+00> : vector<32x128xf32>
    %3 = tpu.matmul %2, %1, %cst {dimension_numbers = #tpu.dot_dimension_numbers<[1], [0], [0], [1], [0, 0, 1, 1], [], []>} : vector<32x4xf32>, vector<4x128xf32>, vector<32x128xf32> -> vector<32x128xf32>
    %c0_4 = arith.constant 0 : index
    %c0_5 = arith.constant 0 : index
    %4 = vector.load %arg4[%c0_4, %c0_5] : memref<32x1xf32, #tpu.memory_space<vmem>>, vector<32x1xf32>
    %5 = vector.broadcast %4 : vector<32x1xf32> to vector<32x128xf32>
    %6 = arith.addf %3, %5 : vector<32x128xf32>
    %cst_6 = arith.constant 0.00999999977 : f32
    %7 = vector.broadcast %cst_6 : f32 to vector<32x128xf32>
    %8 = arith.mulf %7, %6 : vector<32x128xf32>
    %9 = arith.maximumf %6, %8 : vector<32x128xf32>
    %c0_7 = arith.constant 0 : index
    %c0_8 = arith.constant 0 : index
    %10 = vector.load %arg5[%c0_7, %c0_8] : memref<4x32xf32, #tpu.memory_space<vmem>>, vector<4x32xf32>
    %cst_9 = arith.constant dense<0.000000e+00> : vector<4x128xf32>
    %11 = tpu.matmul %10, %9, %cst_9 {dimension_numbers = #tpu.dot_dimension_numbers<[1], [0], [0], [1], [0, 0, 1, 1], [], []>} : vector<4x32xf32>, vector<32x128xf32>, vector<4x128xf32> -> vector<4x128xf32>
    %c0_10 = arith.constant 0 : index
    %c0_11 = arith.constant 0 : index
    %12 = vector.load %arg6[%c0_10, %c0_11] : memref<4x1xf32, #tpu.memory_space<vmem>>, vector<4x1xf32>
    %13 = vector.broadcast %12 : vector<4x1xf32> to vector<4x128xf32>
    %14 = arith.addf %11, %13 : vector<4x128xf32>
    %c0_12 = arith.constant 0 : index
    %c0_13 = arith.constant 0 : index
    %c0_14 = arith.constant 0 : index
    %15 = vector.load %arg7[%c0_12, %c0_13, %c0_14] : memref<1x4x128xf32, #tpu.memory_space<vmem>>, vector<1x4x128xf32>
    %16 = vector.shape_cast %15 : vector<1x4x128xf32> to vector<4x128xf32>
    %17 = vector.shape_cast %14 : vector<4x128xf32> to vector<1x4x128xf32>
    tpu.vector_store %arg7[%c0_12, %c0_13, %c0_14], %17 {strides = array<i32>} : memref<1x4x128xf32, #tpu.memory_space<vmem>>, vector<1x4x128xf32>,
    return
  }
  func.func @transform_0(%arg0: i32, %arg1: i32) -> (i32, i32, i32) {
    %c0_i32 = arith.constant 0 : i32
    %c0_i32_0 = arith.constant 0 : i32
    return %arg0, %c0_i32, %arg1 : i32, i32, i32
  }
  func.func @transform_1(%arg0: i32, %arg1: i32) -> (i32, i32) {
    %c0_i32 = arith.constant 0 : i32
    %c0_i32_0 = arith.constant 0 : i32
    %c0_i32_1 = arith.constant 0 : i32
    return %c0_i32, %c0_i32_0 : i32, i32
  }
  func.func @transform_2(%arg0: i32, %arg1: i32) -> (i32, i32) {
    %c0_i32 = arith.constant 0 : i32
    %c0_i32_0 = arith.constant 0 : i32
    %c0_i32_1 = arith.constant 0 : i32
    return %c0_i32, %c0_i32_0 : i32, i32
  }
  func.func @transform_3(%arg0: i32, %arg1: i32) -> (i32, i32) {
    %c0_i32 = arith.constant 0 : i32
    %c0_i32_0 = arith.constant 0 : i32
    %c0_i32_1 = arith.constant 0 : i32
    return %c0_i32, %c0_i32_0 : i32, i32
  }
  func.func @transform_4(%arg0: i32, %arg1: i32) -> (i32, i32) {
    %c0_i32 = arith.constant 0 : i32
    %c0_i32_0 = arith.constant 0 : i32
    %c0_i32_1 = arith.constant 0 : i32
    return %c0_i32, %c0_i32_0 : i32, i32
  }
  func.func @transform_5(%arg0: i32, %arg1: i32) -> (i32, i32, i32) {
    %c0_i32 = arith.constant 0 : i32
    %c0_i32_0 = arith.constant 0 : i32
    return %arg0, %c0_i32, %arg1 : i32, i32, i32
  }
}

</mosaic_0001>

<bundles_post_ra>
// kernel: mlp_forward.1
= control target key start
LH: loop header
LB: loop body
LE: loop exit
PB: predicated region body
PF: predicated region fallthrough
CT: control target
= control target key end

     0   :  { %s735_s18 = smov 0   ;;  %s737_s19 = smov 0   ;;  %s827_s0 = inlined_call_operand.vmem [shape: f32[2,4,256], index: 0, kind: input, shape index: {}]   ;;  %s828_s1 = inlined_call_operand.vmem [shape: f32[32,4], index: 1, kind: input, shape index: {}]   ;;  %s829_s2 = inlined_call_operand.vmem [shape: f32[32,1], index: 2, kind: input, shape index: {}]   ;;  %s830_s3 = inlined_call_operand.vmem [shape: f32[4,32], index: 3, kind: input, shape index: {}]   ;;  %s831_s4 = inlined_call_operand.vmem [shape: f32[4,1], index: 4, kind: input, shape index: {}]   ;;  %s832_s5 = inlined_call_operand.vmem [shape: f32[2,4,256], index: 5, kind: output, shape index: {}]  }
   0x1   :  { %s739_s20 = smov 0   ;;  %s741_s21 = smov 0  }
   0x2   :  { %s743_s22 = smov 0  }
   0x3 LB: > { %s24_s23 = sadd.s32 1, %s691_s20  ;;  %s27_s24 = sadd.s32 1, %s695_s21  ;;  %s699_s22 = sphi %s743_s22, %s15_s22   ;;  %s695_s21 = sphi %s741_s21, %s836_s21   ;;  %s691_s20 = sphi %s739_s20, %s835_s20   ;;  %s687_s19 = sphi %s737_s19, %s834_s19   ;;  %s683_s18 = sphi %s735_s18, %s833_s18  }
   0x4   : > { %p25_p0 = scmp.ge.s32.totalorder %s24_s23, 2  ;;  %p567_p1 = scmp.ge.s32.totalorder %s699_s22, 1 }
   0x5   : > { %p206_p2 = scmp.lt.s32.totalorder %s699_s22, 5 }
   0x6   : > { %s838_s23 = smov (%p25_p0, %s24_s23), 0  ;;  %s840_s24 = smov (!%p25_p0, %s27_s24), %s695_s21 }
   0x7   : > { %p207_p3 = pnand %p567_p1, %p206_p2  ;;  %p29_p4 = scmp.ge.s32.totalorder %s840_s24, 2 }
   0x8   : > { %p240_p5 = scmp.lt.s32.totalorder (!%p207_p3), %s687_s19, 1  ;;  %p242_p6 = scmp.lt.s32.totalorder (!%p207_p3), %s683_s18, 1  ;;  %v257_v0 = vld [vmem:[%s828_s1] sm:$0xff] (!%p207_p3)  ;;  %vm285_vm0 = vcmask (!%p207_p3), 31744   ;;  %v701_v2 = vmov (!%p207_p3), 0   ;;  %v263_v3 = vld [vmem:[%s829_s2 + $0x10] sm:$0xff] (!%p207_p3) }
   0x9   : > { %s842_s24 = smov (%p29_p4, %s840_s24), 0  ;;  %210 = sbr.rel (%p207_p3) target bundleno = 467 (0x1d3), region = 40 }
   0xa   : > { %592 = vmatprep.mubr.msk.f32.mxu0 (!%p207_p3), %vm285_vm0, %v257_v0  ;;  %v261_v1 = vld [vmem:[%s829_s2] sm:$0xff] (!%p207_p3)  ;;  %659 = vset.pattern.permute.xlu0 (!%p207_p3), %v701_v2  ;;  %v262_v4 = vld [vmem:[%s829_s2 + $0x8] sm:$0xff] (!%p207_p3)  ;;  %v264_v5 = vld [vmem:[%s829_s2 + $0x18] sm:$0xff] (!%p207_p3)  ;;  %vm298_vm1 = vcmask (!%p207_p3), 1043456   ;;  %v702_v11 = vmov (!%p207_p3), 0.0|0.0   ;;  %vm703_vm2 = vmmov (!%p207_p3), 0  }
   0xb   : > { %660 = vset.pattern.permute.xlu1 (!%p207_p3), %v701_v2  ;;  %267 = vperm.xlu0 (!%p207_p3), %659, %v261_v1   ;;  %v258_v7 = vld [vmem:[%s828_s1 + $0x8] sm:$0xff] (!%p207_p3)  ;;  %v396_v8 = vld [vmem:[%s831_s4] sm:$0xf] (!%p207_p3)  ;;  %v259_v9 = vld [vmem:[%s828_s1 + $0x10] sm:$0xff] (!%p207_p3)  ;;  %v704_v12 = vmov (!%p207_p3), 0.0   ;;  %vm402_vm3 = vcmask (!%p207_p3), 261120  }
   0xc   : > { %277 = vperm.xlu1 (!%p207_p3), %660, %v263_v3   ;;  %v260_v10 = vld [vmem:[%s828_s1 + $0x18] sm:$0xff] (!%p207_p3)  ;;  %609 = vmatprep.subr.bf16.mxu1 (!%p207_p3), %v702_v11  ;;  %v395_v35 = vld [vmem:[%s830_s3] sm:$0xf] (!%p207_p3) }
   0xd   : > { %606 = vmatprep.mubr.msk.f32.mxu1 (!%p207_p3), %vm703_vm2, %v704_v12 }
   0xf   : > { %272 = vperm.xlu0 (!%p207_p3), %659, %v262_v4  }
  0x10   : > { %s844_s19 = smov (!%p240_p5, %s687_s19), 1  ;;  %s846_s18 = smov (!%p242_p6, %s683_s18), 1  ;;  %282 = vperm.xlu1 %660, %v264_v5  }
  0x11   : > { %s568_s6 = sshll.u32 %s844_s19, 1 }
  0x12   : > { %s781_s11 = sadd.s32 %s568_s6, %s846_s18 }
  0x13   : > { %s569_s12 = sshll.u32 %s781_s11, 2  ;;  %399 = vperm.xlu0 %659, %v396_v8  }
  0x14   : > { %s247_s15 = scalar_lea.vmem %s827_s0, %s569_s12  ;;  %s255_s8 = scalar_lea.vmem %s832_s5, %s569_s12 }
  0x15   : > { %v256_v6 = vld [vmem:[%s247_s15] sm:$0xf] }
  0x16   : > { %590 = vmatprep.subr.msk.mxu0 %vm298_vm1, %v256_v6 }
  0x17   : > { %591 = vmatpush3.msk.msra.mxu0 %vm298_vm1, %v256_v6 }
  0x18   : > { %593 = vmatmul.mubr.msk.f32.vlgmr.msra.gmra.mrb[0].mxu0 %vm285_vm0, %v258_v7 }
  0x19   : > { %595 = vmatprep.mubr.msk.f32.mxu0 %vm285_vm0, %v259_v9 }
  0x1c   : > { %596 = vmatmul.mubr.msk.f32.gmra.mrb[2].mxu0 %vm285_vm0, %v260_v10 }
  0x8a   : > { %v268_v13 = vpop.permute.xlu0 %267 }
  0x8b   : > { %v278_v14 = vpop.permute.xlu1 %277 }
  0x8e   : > { %v273_v15 = vpop.permute.xlu0 %272 }
  0x8f   : > { %v283_v21 = vpop.permute.xlu1 %282 }
  0x92   : > { %v400_v36 = vpop.permute.xlu0 %399 }
  0xeb   : > { %v594_v16 = vpop.f32.mrb[0].mxu0 }
  0xec   : > { %v374_v17 = vadd.f32 %v594_v16, %v273_v15  ;;  %v368_v18 = vpop.f32.mrb[1].mxu0 }
  0xed   : > { %v369_v19 = vadd.f32 %v368_v18, %v268_v13 }
  0xee   : > { %v388_v20 = vmul.f32 0.01, %v374_v17 }
  0xef   : > { %v387_v22 = vmul.f32 0.01, %v369_v19  ;;  %v597_v23 = vpop.f32.mrb[2].mxu0 }
  0xf0   : > { %v392_v24 = vmax.f32 %v374_v17, %v388_v20  ;;  %v384_v25 = vadd.f32 %v597_v23, %v283_v21  ;;  %v378_v26 = vpop.f32.mrb[3].mxu0 }
  0xf1   : > { %v391_v27 = vmax.f32 %v369_v19, %v387_v22  ;;  %v379_v28 = vadd.f32 %v378_v26, %v278_v14 }
  0xf2   : > { %v390_v29 = vmul.f32 0.01, %v384_v25 }
  0xf3   : > { %v389_v30 = vmul.f32 0.01, %v379_v28  ;;  %v610_v31 = vpack.c.bf16 %v392_v24, %v391_v27 }
  0xf4   : > { %v394_v32 = vmax.f32 %v384_v25, %v390_v29 }
  0xf5   : > { %v393_v33 = vmax.f32 %v379_v28, %v389_v30  ;;  %611 = vmatpush3.bf16.msra.mxu1 %v610_v31 }
  0xf6   : > { %612 = vmatprep.subr.bf16.mxu1 %v702_v11 }
  0xf7   : > { %v613_v34 = vpack.c.bf16 %v394_v32, %v393_v33 }
  0xf9   : > { %614 = vmatpush3.bf16.msra.mxu1 %v613_v34 }
  0xfc   : > { %607 = vmatmul.mubr.msk.f32.vlgmr.msra.gmra.mrb[0].mxu1 %vm402_vm3, %v395_v35 }
 0x1cf   : > { %v472_v37 = vpop.f32.mrb[0].mxu1 }
 0x1d0   : > { %v473_v38 = vadd.f32 %v472_v37, %v400_v36  ;;  %v608_v39 = vpop.f32.mrb[1].mxu1 }
 0x1d2   : > { %476 = vst [vmem:[%s255_s8] sm:$0xf] %v473_v38 }
 0x1d3 PF: > { %s15_s22 = sadd.s32 1, %s699_s22   ;;  %s833_s18 = smov %s691_s20 }
 0x1d4   : > { %p12_p7 = scmp.ge.s32.totalorder %s15_s22, 6   ;;  %s834_s19 = smov %s695_s21 }
 0x1d5   : > { %s835_s20 = smov %s838_s23  ;;  %s836_s21 = smov %s842_s24 }
 0x1d6   :  { %14 = sbr.rel (!%p12_p7) target bundleno = 3 (0x3), region = 70 }

</bundles_post_ra>
